<compile_context>
chip_gen: v7x
topology: tpu7x:2x2x1
jax: 0.10.0
libtpu: 0.0.40
codegen_flags: <defaults>
</compile_context>

<pallas_src>
import functools
import itertools

import numpy as np
import jax
import jax.numpy as jnp
from jax.experimental import pallas as pl
from jax.experimental.pallas import tpu as pltpu


def _round_up(n, m):
    return ((n + m - 1) // m) * m


def _rules_kernel(x_ref, rules_t_ref, o_ref, *, intersection):
    # x_ref: [tile, F] f32, rules_t_ref: [F, R_pad] f32 (0/1), o_ref: [tile, R_pad] f32
    x = x_ref[...]                                   # [tile, F]
    n_f = x.shape[1]

    # Zero membership values (or inactive antecedents) act as the reduction
    # identity; precompute once per tile.
    x_safe = jnp.where(x == 0.0, 1.0, x)             # [tile, F]
    masks = rules_t_ref[...] != 0.0                  # [F, R_pad] bool

    if intersection == "larsen":
        combine = lambda a, t: a * t                 # product t-norm
    elif intersection == "mamdani":
        combine = jnp.minimum                        # min t-norm
    else:
        raise ValueError(f"unknown intersection: {intersection}")

    # Static unroll over the (small) number of membership functions F.
    # Per f: [1, R_pad] rule mask (sublane broadcast) selects between the
    # [tile, 1] membership column (lane broadcast) and identity 1.0.
    acc = None
    for f in range(n_f):
        term = jnp.where(masks[f:f + 1, :], x_safe[:, f:f + 1], 1.0)  # [tile, R_pad]
        acc = term if acc is None else combine(acc, term)

    o_ref[...] = acc.astype(o_ref.dtype)


def rules_forward(x, active_antecedents_rules, intersection="larsen", row_tile=512):
    """x: [B, L, F] float32, active_antecedents_rules: [R, F] in {0,1} -> [B, L, R]."""
    B, L, F = x.shape
    R = active_antecedents_rules.shape[0]

    # --- one-time rule-matrix preparation (hoist to model setup in practice) ---
    R_pad = _round_up(R, 128)                         # lane-dense output
    rules_t = jnp.asarray(active_antecedents_rules, jnp.float32).T      # [F, R]
    rules_t = jnp.pad(rules_t, ((0, 0), (0, R_pad - R)))                # [F, R_pad]

    # --- fuse batch and line dims into one row axis and tile it ---
    rows = B * L
    x2 = x.reshape(rows, F).astype(jnp.float32)

    # VMEM-aware row-tile choice (conservative against the smallest scoped
    # default across generations, ~16 MiB on v5e; v7x's 64 MiB physical VMEM
    # is also comfortably respected).
    budget = 16 * 1024 * 1024
    fixed = 2 * F * R_pad * 4                         # resident rules block (x2 buffers)
    per_row = 2 * (F + R_pad) * 4                     # double-buffered x + out rows
    max_tile = max(8, ((budget - fixed) // per_row) // 8 * 8)
    tile = int(min(row_tile, max_tile, _round_up(rows, 8)))
    tile = max(8, (tile // 8) * 8)

    rows_pad = _round_up(rows, tile)
    if rows_pad != rows:
        x2 = jnp.pad(x2, ((0, rows_pad - rows), (0, 0)))

    kernel = functools.partial(_rules_kernel, intersection=intersection)
    out = pl.pallas_call(
        kernel,
        out_shape=jax.ShapeDtypeStruct((rows_pad, R_pad), jnp.float32),
        grid_spec=pltpu.PrefetchScalarGridSpec(
            num_scalar_prefetch=0,
            grid=(rows_pad // tile,),
            in_specs=[
                pl.BlockSpec((tile, F), lambda i: (i, 0)),
                pl.BlockSpec((F, R_pad), lambda i: (0, 0)),   # resident across grid
            ],
            out_specs=pl.BlockSpec((tile, R_pad), lambda i: (i, 0)),
        ),
        compiler_params=pltpu.CompilerParams(
            dimension_semantics=("parallel",),        # row-tile axis: megacore-shardable
        ),
    )(x2, rules_t)

    # strip row padding and dummy (all-zero) rule columns, restore [B, L, R]
    return out[:rows, :R].reshape(B, L, R)


def generate_rules(n_mfs_per_universe):
    """Deterministic rule matrix: one membership function per universe, all
    combinations -> binary matrix [R, F] with R = prod(n_mfs), F = sum(n_mfs)."""
    offsets = np.cumsum([0] + list(n_mfs_per_universe[:-1]))
    F = int(np.sum(n_mfs_per_universe))
    combos = list(itertools.product(*[range(int(n)) for n in n_mfs_per_universe]))
    rules = np.zeros((len(combos), F), dtype=np.float32)
    for r, combo in enumerate(combos):
        for u, m in enumerate(combo):
            rules[r, offsets[u] + m] = 1.0
    return jnp.asarray(rules)


def _reference(x, rules, intersection):
    expanded = x[:, :, None, :] * rules[None, None, :, :]   # [B, L, R, F]
    masked = jnp.where(expanded == 0.0, 1.0, expanded)
    if intersection == "larsen":
        red = jnp.prod(masked, axis=-1, keepdims=True)
    else:
        red = jnp.min(masked, axis=-1, keepdims=True)
    return red[:, :, :, 0]


if __name__ == "__main__":
    B, L = 2, 8
    n_mfs = (3, 3)                  # two input universes, 3 MFs each -> F=6, R=9
    rules = generate_rules(n_mfs)   # deterministic "active_antecedents_rules"
    R, F = rules.shape

    key = jax.random.PRNGKey(0)
    x = jax.random.uniform(key, (B, L, F), dtype=jnp.float32)

    ok = True
    for inter in ("larsen", "mamdani"):
        out = rules_forward(x, rules, intersection=inter)
        out = jax.block_until_ready(out)
        ref = _reference(x, rules, inter)
        assert out.shape == (B, L, R)
        np.testing.assert_allclose(np.asarray(out), np.asarray(ref), rtol=1e-6, atol=1e-6)

    if ok:
        print("KERNEL_OK")
</pallas_src>

<mosaic_0001>
module attributes {stable_mosaic.version = 11 : i64} {
  func.func @_rules_kernel(%arg0: i32, %arg1: memref<16x6xf32, #tpu.memory_space<vmem>>, %arg2: memref<6x128xf32, #tpu.memory_space<vmem>>, %arg3: memref<16x128xf32, #tpu.memory_space<vmem>>) attributes {dimension_semantics = [#tpu.dimension_semantics<parallel>], iteration_bounds = array<i64: 1>, scalar_prefetch = 0 : i64, scratch_operands = 0 : i64, tpu.core_type = #tpu.core_type<tc>, window_params = [{transform_indices = @transform_0, window_bounds = array<i64: 16, 6>}, {pipeline_mode = #tpu.pipeline_mode<synchronous>, transform_indices = @transform_1, window_bounds = array<i64: 6, 128>}, {transform_indices = @transform_2, window_bounds = array<i64: 16, 128>}]} {
    %c0 = arith.constant 0 : index
    %c0_0 = arith.constant 0 : index
    %0 = vector.load %arg1[%c0, %c0_0] : memref<16x6xf32, #tpu.memory_space<vmem>>, vector<16x6xf32>
    %cst = arith.constant 0.000000e+00 : f32
    %1 = vector.broadcast %cst : f32 to vector<16x6xf32>
    %2 = arith.cmpf oeq, %0, %1 : vector<16x6xf32>
    %cst_1 = arith.constant 1.000000e+00 : f32
    %3 = vector.broadcast %cst_1 : f32 to vector<16x6xf32>
    %4 = arith.select %2, %3, %0 : vector<16x6xi1>, vector<16x6xf32>
    %c0_2 = arith.constant 0 : index
    %c0_3 = arith.constant 0 : index
    %5 = vector.load %arg2[%c0_2, %c0_3] : memref<6x128xf32, #tpu.memory_space<vmem>>, vector<6x128xf32>
    %cst_4 = arith.constant 0.000000e+00 : f32
    %6 = vector.broadcast %cst_4 : f32 to vector<6x128xf32>
    %7 = arith.cmpf one, %5, %6 : vector<6x128xf32>
    %8 = vector.extract_strided_slice %7 {offsets = [0, 0], sizes = [1, 128], strides = [1, 1]} : vector<6x128xi1> to vector<1x128xi1>
    %9 = vector.extract_strided_slice %4 {offsets = [0, 0], sizes = [16, 1], strides = [1, 1]} : vector<16x6xf32> to vector<16x1xf32>
    %cst_5 = arith.constant 1.000000e+00 : f32
    %10 = vector.shape_cast %8 : vector<1x128xi1> to vector<1x128xi1>
    %11 = vector.broadcast %10 : vector<1x128xi1> to vector<16x128xi1>
    %12 = vector.shape_cast %9 : vector<16x1xf32> to vector<16x1xf32>
    %13 = vector.broadcast %12 : vector<16x1xf32> to vector<16x128xf32>
    %14 = vector.broadcast %cst_5 : f32 to vector<16x128xf32>
    %15 = arith.select %11, %13, %14 : vector<16x128xi1>, vector<16x128xf32>
    %16 = vector.extract_strided_slice %7 {offsets = [1, 0], sizes = [1, 128], strides = [1, 1]} : vector<6x128xi1> to vector<1x128xi1>
    %17 = vector.extract_strided_slice %4 {offsets = [0, 1], sizes = [16, 1], strides = [1, 1]} : vector<16x6xf32> to vector<16x1xf32>
    %cst_6 = arith.constant 1.000000e+00 : f32
    %18 = vector.shape_cast %16 : vector<1x128xi1> to vector<1x128xi1>
    %19 = vector.broadcast %18 : vector<1x128xi1> to vector<16x128xi1>
    %20 = vector.shape_cast %17 : vector<16x1xf32> to vector<16x1xf32>
    %21 = vector.broadcast %20 : vector<16x1xf32> to vector<16x128xf32>
    %22 = vector.broadcast %cst_6 : f32 to vector<16x128xf32>
    %23 = arith.select %19, %21, %22 : vector<16x128xi1>, vector<16x128xf32>
    %24 = arith.mulf %15, %23 : vector<16x128xf32>
    %25 = vector.extract_strided_slice %7 {offsets = [2, 0], sizes = [1, 128], strides = [1, 1]} : vector<6x128xi1> to vector<1x128xi1>
    %26 = vector.extract_strided_slice %4 {offsets = [0, 2], sizes = [16, 1], strides = [1, 1]} : vector<16x6xf32> to vector<16x1xf32>
    %cst_7 = arith.constant 1.000000e+00 : f32
    %27 = vector.shape_cast %25 : vector<1x128xi1> to vector<1x128xi1>
    %28 = vector.broadcast %27 : vector<1x128xi1> to vector<16x128xi1>
    %29 = vector.shape_cast %26 : vector<16x1xf32> to vector<16x1xf32>
    %30 = vector.broadcast %29 : vector<16x1xf32> to vector<16x128xf32>
    %31 = vector.broadcast %cst_7 : f32 to vector<16x128xf32>
    %32 = arith.select %28, %30, %31 : vector<16x128xi1>, vector<16x128xf32>
    %33 = arith.mulf %24, %32 : vector<16x128xf32>
    %34 = vector.extract_strided_slice %7 {offsets = [3, 0], sizes = [1, 128], strides = [1, 1]} : vector<6x128xi1> to vector<1x128xi1>
    %35 = vector.extract_strided_slice %4 {offsets = [0, 3], sizes = [16, 1], strides = [1, 1]} : vector<16x6xf32> to vector<16x1xf32>
    %cst_8 = arith.constant 1.000000e+00 : f32
    %36 = vector.shape_cast %34 : vector<1x128xi1> to vector<1x128xi1>
    %37 = vector.broadcast %36 : vector<1x128xi1> to vector<16x128xi1>
    %38 = vector.shape_cast %35 : vector<16x1xf32> to vector<16x1xf32>
    %39 = vector.broadcast %38 : vector<16x1xf32> to vector<16x128xf32>
    %40 = vector.broadcast %cst_8 : f32 to vector<16x128xf32>
    %41 = arith.select %37, %39, %40 : vector<16x128xi1>, vector<16x128xf32>
    %42 = arith.mulf %33, %41 : vector<16x128xf32>
    %43 = vector.extract_strided_slice %7 {offsets = [4, 0], sizes = [1, 128], strides = [1, 1]} : vector<6x128xi1> to vector<1x128xi1>
    %44 = vector.extract_strided_slice %4 {offsets = [0, 4], sizes = [16, 1], strides = [1, 1]} : vector<16x6xf32> to vector<16x1xf32>
    %cst_9 = arith.constant 1.000000e+00 : f32
    %45 = vector.shape_cast %43 : vector<1x128xi1> to vector<1x128xi1>
    %46 = vector.broadcast %45 : vector<1x128xi1> to vector<16x128xi1>
    %47 = vector.shape_cast %44 : vector<16x1xf32> to vector<16x1xf32>
    %48 = vector.broadcast %47 : vector<16x1xf32> to vector<16x128xf32>
    %49 = vector.broadcast %cst_9 : f32 to vector<16x128xf32>
    %50 = arith.select %46, %48, %49 : vector<16x128xi1>, vector<16x128xf32>
    %51 = arith.mulf %42, %50 : vector<16x128xf32>
    %52 = vector.extract_strided_slice %7 {offsets = [5, 0], sizes = [1, 128], strides = [1, 1]} : vector<6x128xi1> to vector<1x128xi1>
    %53 = vector.extract_strided_slice %4 {offsets = [0, 5], sizes = [16, 1], strides = [1, 1]} : vector<16x6xf32> to vector<16x1xf32>
    %cst_10 = arith.constant 1.000000e+00 : f32
    %54 = vector.shape_cast %52 : vector<1x128xi1> to vector<1x128xi1>
    %55 = vector.broadcast %54 : vector<1x128xi1> to vector<16x128xi1>
    %56 = vector.shape_cast %53 : vector<16x1xf32> to vector<16x1xf32>
    %57 = vector.broadcast %56 : vector<16x1xf32> to vector<16x128xf32>
    %58 = vector.broadcast %cst_10 : f32 to vector<16x128xf32>
    %59 = arith.select %55, %57, %58 : vector<16x128xi1>, vector<16x128xf32>
    %60 = arith.mulf %51, %59 : vector<16x128xf32>
    %c0_11 = arith.constant 0 : index
    %c0_12 = arith.constant 0 : index
    %61 = vector.load %arg3[%c0_11, %c0_12] : memref<16x128xf32, #tpu.memory_space<vmem>>, vector<16x128xf32>
    tpu.vector_store %arg3[%c0_11, %c0_12], %60 {strides = array<i32>} : memref<16x128xf32, #tpu.memory_space<vmem>>, vector<16x128xf32>,
    return
  }
  func.func @transform_0(%arg0: i32) -> (i32, i32) {
    %c0_i32 = arith.constant 0 : i32
    %c0_i32_0 = arith.constant 0 : i32
    return %arg0, %c0_i32 : i32, i32
  }
  func.func @transform_1(%arg0: i32) -> (i32, i32) {
    %c0_i32 = arith.constant 0 : i32
    %c0_i32_0 = arith.constant 0 : i32
    %c0_i32_1 = arith.constant 0 : i32
    return %c0_i32, %c0_i32_0 : i32, i32
  }
  func.func @transform_2(%arg0: i32) -> (i32, i32) {
    %c0_i32 = arith.constant 0 : i32
    %c0_i32_0 = arith.constant 0 : i32
    return %arg0, %c0_i32 : i32, i32
  }
}

</mosaic_0001>

<bundles_post_ra>
// kernel: tpu_custom_call.1
= control target key start
LH: loop header
LB: loop body
LE: loop exit
PB: predicated region body
PF: predicated region fallthrough
CT: control target
= control target key end

     0   :  { %v769_v2 = vmov 1   ;;  %v770_v3 = vmov 0   ;;  %s1289_s0 = inlined_call_operand.vmem [shape: f32[16,6], index: 0, kind: input, shape index: {}]   ;;  %s1290_s1 = inlined_call_operand.vmem [shape: f32[6,128], index: 1, kind: input, shape index: {}]   ;;  %s1291_s2 = inlined_call_operand.hbm [shape: f32[16,128], index: 2, kind: output, shape index: {}]  }
   0x1   :  { %v12_v0 = vld [vmem:[%s1289_s0] sm:$0xff]  ;;  %v13_v1 = vld [vmem:[%s1289_s0 + $0x8] sm:$0xff]  ;;  %736 = vset.pattern.permute.xlu0 %v769_v2  ;;  %737 = vset.pattern.permute.xlu1 %v770_v3 }
   0x2   :  { %vm14_vm0 = vcmp.eq.f32.partialorder %v12_v0, 0.0  ;;  %vm15_vm1 = vcmp.eq.f32.partialorder %v13_v1, 0.0 }
   0x3   :  { %v16_v4 = vsel %vm14_vm0, 1.0, %v12_v0 }
   0x4   :  { %7 = vsyncpa [#allocation3], 0  ;;  %24 = vperm.xlu1 %737, %v16_v4   ;;  %77 = vperm.xlu0 %736, %v16_v4   ;;  %v17_v5 = vsel %vm15_vm1, 1.0, %v13_v1  ;;  %v771_v6 = vmov 2   ;;  %v772_v7 = vmov 3   ;;  %v773_v8 = vmov 4  }
   0x5   :  { %v774_v9 = vmov 5   ;;  %v802_v10 = vld [vmem:[%s1290_s1] sm:$0x3f]  ;;  %vm673_vm3 = vcmask 1041409   ;;  %vm676_vm4 = vcmask 1042434   ;;  %vm679_vm5 = vcmask 1043459  }
   0x6   :  { %vm19_vm2 = vcmp.ne.f32.partialorder %v802_v10, 0.0  ;;  %vm682_vm6 = vcmask 1044484   ;;  %vm685_vm7 = vcmask 1045509   ;;  %vm688_vm8 = vcmask 1046534   ;;  %s775_s1 = smov [#allocation2]  }
   0x7   :  { %vm691_vm9 = vcmask 1047559   ;;  %s716_s14 = sshll.u32 %s775_s1, 4  ;;  %s717_s14 = int_to_ptr.vmem [resolvable:$true] %s716_s14 }
   0x8   :  { %28 = vperm.xlu1 %737, %v17_v5   ;;  %80 = vperm.xlu0 %736, %v17_v5   ;;  %s745_s15 = scalar_lea.vmem %s717_s14, 256  ;;  %p750_p1 = scmp.lt.s32.totalorder %s717_s14, %s717_s14 }
   0x9   :  { %p746_p0 = scmp.ne.s32.totalorder %s717_s14, %s745_s15  ;;  %p751_p2 = scmp.lt.s32.totalorder %s745_s15, %s745_s15 }
   0xb   :  { %p752_p3 = por %p751_p2, %p750_p1 }
   0xc   :  { %739 = vset.pattern.permute.xlu1 %v771_v6  ;;  %738 = vset.pattern.permute.xlu0 %v771_v6 }
   0xd   :  { %196 = vperm.xlu1 %739, %v17_v5   ;;  %193 = vperm.xlu0 %738, %v16_v4   ;;  %p753_p4 = pnand %p752_p3, %p746_p0 }
  0x11   :  { %740 = vset.pattern.permute.xlu1 %v772_v7  ;;  %741 = vset.pattern.permute.xlu0 %v772_v7 }
  0x12   :  { %309 = vperm.xlu1 %740, %v16_v4   ;;  %312 = vperm.xlu0 %741, %v17_v5  }
  0x16   :  { %742 = vset.pattern.permute.xlu1 %v773_v8  ;;  %743 = vset.pattern.permute.xlu0 %v774_v9 }
  0x17   :  { %425 = vperm.xlu1 %742, %v16_v4   ;;  %541 = vperm.xlu0 %743, %v16_v4  }
  0x1b   :  { %428 = vperm.xlu1 %742, %v17_v5  }
  0x1f   :  { %744 = vset.pattern.permute.xlu1 %v774_v9 }
  0x20   :  { %544 = vperm.xlu1 %744, %v17_v5  }
  0x83   :  { %v25_v11 = vpop.permute.xlu1 %24  ;;  %v78_v16 = vpop.permute.xlu0 %77 }
  0x84   :  { %v30_v12 = vrot.slane %v25_v11, 1  ;;  %v31_v13 = vrot.slane %v25_v11, 2  ;;  %v32_v14 = vrot.slane %v25_v11, 3  ;;  %v33_v15 = vrot.slane %v25_v11, 4 }
  0x85   :  { %v34_v17 = vrot.slane %v25_v11, 5  ;;  %v35_v18 = vrot.slane %v25_v11, 6  ;;  %v36_v19 = vrot.slane %v25_v11, 7  ;;  %v60_v20 = vsel %vm19_vm2, %v25_v11, 1.0 }
  0x86   :  { %v61_v21 = vsel %vm19_vm2, %v30_v12, 1.0  ;;  %v811_v22 = vsel %vm19_vm2, %v31_v13, 1.0  ;;  %v63_v23 = vsel %vm19_vm2, %v32_v14, 1.0  ;;  %v64_v24 = vsel %vm19_vm2, %v33_v15, 1.0 }
  0x87   :  { %v65_v25 = vsel %vm19_vm2, %v34_v17, 1.0  ;;  %v821_v26 = vsel %vm19_vm2, %v35_v18, 1.0  ;;  %v82_v27 = vrot.slane %v78_v16, 7  ;;  %v83_v28 = vrot.slane %v78_v16, 1  ;;  %v29_v44 = vpop.permute.xlu1 %28  ;;  %v81_v61 = vpop.permute.xlu0 %80 }
  0x88   :  { %v84_v29 = vrot.slane %v78_v16, 2  ;;  %v85_v30 = vrot.slane %v78_v16, 3  ;;  %v86_v31 = vrot.slane %v78_v16, 4  ;;  %v87_v32 = vrot.slane %v78_v16, 5 }
  0x89   :  { %v88_v33 = vrot.slane %v78_v16, 6  ;;  %v112_v34 = vsel %vm19_vm2, %v82_v27, 1.0  ;;  %v113_v35 = vsel %vm19_vm2, %v78_v16, 1.0  ;;  %v829_v36 = vsel %vm19_vm2, %v83_v28, 1.0 }
  0x8a   :  { %v115_v37 = vsel %vm19_vm2, %v84_v29, 1.0  ;;  %v116_v38 = vsel %vm19_vm2, %v85_v30, 1.0  ;;  %v117_v39 = vsel %vm19_vm2, %v86_v31, 1.0  ;;  %v839_v40 = vsel %vm19_vm2, %v87_v32, 1.0 }
  0x8b   :  { %v843_v41 = vsel %vm19_vm2, %v88_v33, 1.0  ;;  %v144_v42 = vrot.slane %v112_v34, 1  ;;  %v145_v43 = vrot.slane %v113_v35, 1  ;;  %v847_v45 = vsel %vm19_vm2, %v36_v19, 1.0 }
  0x8c   :  { %v147_v46 = vrot.slane %v115_v37, 1  ;;  %v148_v47 = vrot.slane %v116_v38, 1  ;;  %v149_v48 = vrot.slane %v117_v39, 1  ;;  %v146_v49 = vrot.slane %v829_v36, 1  ;;  %v197_v29 = vpop.permute.xlu1 %196 }
  0x8d   :  { %v852_v52 = vmul.f32 %v144_v42, %v60_v20  ;;  %v854_v53 = vmul.f32 %v145_v43, %v61_v21  ;;  %v37_v56 = vrot.slane %v29_v44, 1  ;;  %v38_v57 = vrot.slane %v29_v44, 2 }
  0x8e   :  { %v856_v54 = vmul.f32 %v147_v46, %v63_v23  ;;  %v858_v55 = vmul.f32 %v148_v47, %v64_v24  ;;  %v39_v58 = vrot.slane %v29_v44, 3  ;;  %v40_v59 = vrot.slane %v29_v44, 4 }
  0x8f   :  { %v41_v60 = vrot.slane %v29_v44, 5  ;;  %v860_v62 = vmul.f32 %v149_v48, %v65_v25  ;;  %v42_v63 = vrot.slane %v29_v44, 6  ;;  %v43_v0 = vrot.slane %v29_v44, 7 }
  0x90   :  { %v68_v1 = vsel %vm19_vm2, %v29_v44, 1.0  ;;  %v69_v2 = vsel %vm19_vm2, %v37_v56, 1.0  ;;  %v70_v3 = vsel %vm19_vm2, %v38_v57, 1.0  ;;  %v71_v4 = vsel %vm19_vm2, %v39_v58, 1.0 }
  0x91   :  { %v72_v5 = vsel %vm19_vm2, %v40_v59, 1.0  ;;  %v73_v6 = vsel %vm19_vm2, %v41_v60, 1.0  ;;  %v876_v7 = vsel %vm19_vm2, %v42_v63, 1.0  ;;  %v89_v8 = vrot.slane %v81_v61, 7 }
  0x92   :  { %v90_v9 = vrot.slane %v81_v61, 1  ;;  %v91_v11 = vrot.slane %v81_v61, 2  ;;  %v92_v12 = vrot.slane %v81_v61, 3  ;;  %v93_v13 = vrot.slane %v81_v61, 4 }
  0x93   :  { %v94_v14 = vrot.slane %v81_v61, 5  ;;  %v95_v15 = vrot.slane %v81_v61, 6  ;;  %v120_v16 = vsel %vm19_vm2, %v89_v8, 1.0  ;;  %v121_v17 = vsel %vm19_vm2, %v81_v61, 1.0  ;;  %v194_v8 = vpop.permute.xlu0 %193 }
  0x94   :  { %v122_v18 = vsel %vm19_vm2, %v90_v9, 1.0  ;;  %v123_v19 = vsel %vm19_vm2, %v91_v11, 1.0  ;;  %v124_v20 = vsel %vm19_vm2, %v92_v12, 1.0  ;;  %v125_v21 = vsel %vm19_vm2, %v93_v13, 1.0 }
  0x95   :  { %v892_v23 = vsel %vm19_vm2, %v94_v14, 1.0  ;;  %v896_v24 = vsel %vm19_vm2, %v95_v15, 1.0  ;;  %v152_v25 = vrot.slane %v120_v16, 1  ;;  %v153_v27 = vrot.slane %v121_v17, 1 }
  0x96   :  { %v154_v28 = vrot.slane %v122_v18, 1  ;;  %v900_v30 = vsel %vm19_vm2, %v43_v0, 1.0  ;;  %v155_v31 = vrot.slane %v123_v19, 1  ;;  %v156_v32 = vrot.slane %v124_v20, 1 }
  0x97   :  { %v157_v33 = vrot.slane %v125_v21, 1  ;;  %v184_v37 = vmul.f32 %v152_v25, %v68_v1  ;;  %v185_v38 = vmul.f32 %v153_v27, %v69_v2  ;;  %v205_v44 = vrot.slane %v197_v29, 6 }
  0x98   :  { %v904_v39 = vmul.f32 %v155_v31, %v71_v4  ;;  %v188_v42 = vmul.f32 %v156_v32, %v72_v5  ;;  %v186_v43 = vmul.f32 %v154_v28, %v70_v3  ;;  %v206_v46 = vrot.slane %v197_v29, 7 }
  0x99   :  { %v207_v47 = vrot.slane %v197_v29, 1  ;;  %v208_v48 = vrot.slane %v197_v29, 2  ;;  %v209_v56 = vrot.slane %v197_v29, 3  ;;  %v210_v57 = vrot.slane %v197_v29, 4 }
  0x9a   :  { %v211_v58 = vrot.slane %v197_v29, 5  ;;  %v236_v59 = vsel %vm19_vm2, %v205_v44, 1.0  ;;  %v238_v60 = vsel %vm19_vm2, %v197_v29, 1.0  ;;  %v237_v61 = vsel %vm19_vm2, %v206_v46, 1.0 }
  0x9b   :  { %v914_v63 = vsel %vm19_vm2, %v207_v47, 1.0  ;;  %v240_v0 = vsel %vm19_vm2, %v208_v48, 1.0  ;;  %v920_v1 = vsel %vm19_vm2, %v209_v56, 1.0  ;;  %v922_v2 = vmul.f32 %v157_v33, %v73_v6 }
  0x9c   :  { %v926_v3 = vsel %vm19_vm2, %v210_v57, 1.0  ;;  %v268_v4 = vrot.slane %v236_v59, 2  ;;  %v269_v5 = vrot.slane %v237_v61, 2  ;;  %v930_v9 = vsel %vm19_vm2, %v211_v58, 1.0 }
  0x9d   :  { %v270_v11 = vrot.slane %v238_v60, 2  ;;  %v271_v12 = vrot.slane %v914_v63, 2  ;;  %v272_v13 = vrot.slane %v240_v0, 2  ;;  %v273_v14 = vrot.slane %v920_v1, 2 }
  0x9e   :  { %v935_v15 = vmul.f32 %v268_v4, %v184_v37  ;;  %v937_v16 = vmul.f32 %v269_v5, %v185_v38  ;;  %v178_v18 = vmul.f32 %v146_v49, %v811_v22  ;;  %v198_v19 = vrot.slane %v194_v8, 6  ;;  %v962_v38 = vpop.permute.xlu1 %309 }
  0x9f   :  { %v939_v17 = vmul.f32 %v270_v11, %v186_v43  ;;  %v199_v20 = vrot.slane %v194_v8, 7  ;;  %v200_v21 = vrot.slane %v194_v8, 1  ;;  %v201_v25 = vrot.slane %v194_v8, 2 }
  0xa0   :  { %v202_v27 = vrot.slane %v194_v8, 3  ;;  %v203_v28 = vrot.slane %v194_v8, 4  ;;  %v204_v29 = vrot.slane %v194_v8, 5  ;;  %v228_v31 = vsel %vm19_vm2, %v198_v19, 1.0 }
  0xa1   :  { %v229_v32 = vsel %vm19_vm2, %v199_v20, 1.0  ;;  %v230_v33 = vsel %vm19_vm2, %v194_v8, 1.0  ;;  %v231_v36 = vsel %vm19_vm2, %v200_v21, 1.0  ;;  %v232_v22 = vsel %vm19_vm2, %v201_v25, 1.0 }
  0xa2   :  { %v956_v49 = vsel %vm19_vm2, %v202_v27, 1.0  ;;  %v960_v37 = vsel %vm19_vm2, %v203_v28, 1.0  ;;  %v964_v43 = vmul.f32 %v272_v13, %v188_v42  ;;  %v260_v44 = vrot.slane %v228_v31, 2 }
  0xa3   :  { %v261_v46 = vrot.slane %v229_v32, 2  ;;  %v262_v47 = vrot.slane %v230_v33, 2  ;;  %v968_v48 = vsel %vm19_vm2, %v204_v29, 1.0  ;;  %v263_v56 = vrot.slane %v231_v36, 2 }
  0xa4   :  { %v264_v57 = vrot.slane %v232_v22, 2  ;;  %v265_v58 = vrot.slane %v956_v49, 2  ;;  %v973_v60 = vmul.f32 %v260_v44, %v852_v52  ;;  %v314_v42 = vrot.slane %v962_v38, 5 }
  0xa5   :  { %v976_v61 = vmul.f32 %v261_v46, %v854_v53  ;;  %v979_v63 = vmul.f32 %v262_v47, %v178_v18  ;;  %v315_v4 = vrot.slane %v962_v38, 6  ;;  %v316_v5 = vrot.slane %v962_v38, 7 }
  0xa6   :  { %v982_v0 = vmul.f32 %v264_v57, %v858_v55  ;;  %v295_v8 = vmul.f32 %v263_v56, %v856_v54  ;;  %v317_v11 = vrot.slane %v962_v38, 1  ;;  %v318_v52 = vrot.slane %v962_v38, 2  ;;  %v999_v54 = vpop.permute.xlu0 %312 }
  0xa7   :  { %v319_v53 = vrot.slane %v962_v38, 3  ;;  %v344_v13 = vsel %vm19_vm2, %v314_v42, 1.0  ;;  %v345_v18 = vsel %vm19_vm2, %v315_v4, 1.0  ;;  %v346_v55 = vsel %vm19_vm2, %v316_v5, 1.0 }
  0xa8   :  { %v347_v19 = vsel %vm19_vm2, %v962_v38, 1.0  ;;  %v348_v21 = vsel %vm19_vm2, %v317_v11, 1.0  ;;  %v349_v25 = vsel %vm19_vm2, %v318_v52, 1.0  ;;  %v376_v28 = vrot.slane %v344_v13, 3  ;;  %v1025_v52 = vpop.permute.xlu1 %425 }
  0xa9   :  { %v1008_v27 = vsel %vm19_vm2, %v319_v53, 1.0  ;;  %v377_v29 = vrot.slane %v345_v18, 3  ;;  %v378_v31 = vrot.slane %v346_v55, 3  ;;  %v379_v32 = vrot.slane %v347_v19, 3 }
  0xaa   :  { %v380_v33 = vrot.slane %v348_v21, 3  ;;  %v381_v36 = vrot.slane %v349_v25, 3  ;;  %v321_v22 = vrot.slane %v999_v54, 5  ;;  %v322_v44 = vrot.slane %v999_v54, 6  ;;  %v1080_v19 = vpop.permute.xlu0 %541 }
  0xab   :  { %v303_v46 = vmul.f32 %v271_v12, %v904_v39  ;;  %v323_v47 = vrot.slane %v999_v54, 7  ;;  %v324_v56 = vrot.slane %v999_v54, 1  ;;  %v325_v57 = vrot.slane %v999_v54, 2 }
  0xac   :  { %v411_v42 = vmul.f32 %v379_v32, %v295_v8  ;;  %v326_v4 = vrot.slane %v999_v54, 3  ;;  %v1019_v5 = vsel %vm19_vm2, %v321_v22, 1.0  ;;  %v1023_v11 = vsel %vm19_vm2, %v322_v44, 1.0 }
  0xad   :  { %v1030_v12 = vsel %vm19_vm2, %v323_v47, 1.0  ;;  %v355_v8 = vsel %vm19_vm2, %v999_v54, 1.0  ;;  %v1037_v53 = vsel %vm19_vm2, %v324_v56, 1.0  ;;  %v1041_v13 = vsel %vm19_vm2, %v325_v57, 1.0 }
  0xae   :  { %v1045_v18 = vsel %vm19_vm2, %v326_v4, 1.0  ;;  %v384_v55 = vrot.slane %v1019_v5, 3  ;;  %v387_v25 = vrot.slane %v355_v8, 3  ;;  %v430_v22 = vrot.slane %v1025_v52, 4 }
  0xaf   :  { %v431_v44 = vrot.slane %v1025_v52, 5  ;;  %v432_v47 = vrot.slane %v1025_v52, 6  ;;  %v433_v56 = vrot.slane %v1025_v52, 7  ;;  %v434_v57 = vrot.slane %v1025_v52, 1 }
  0xb0   :  { %v1057_v39 = vmul.f32 %v387_v25, %v303_v46  ;;  %v460_v8 = vsel %vm19_vm2, %v430_v22, 1.0  ;;  %v464_v34 = vsel %vm19_vm2, %v1025_v52, 1.0  ;;  %v410_v4 = vmul.f32 %v378_v31, %v979_v63 }
  0xb1   :  { %v461_v6 = vsel %vm19_vm2, %v431_v44, 1.0  ;;  %v462_v59 = vsel %vm19_vm2, %v432_v47, 1.0  ;;  %v463_v35 = vsel %vm19_vm2, %v433_v56, 1.0  ;;  %v465_v46 = vsel %vm19_vm2, %v434_v57, 1.0 }
  0xb2   :  { %v492_v25 = vrot.slane %v460_v8, 4  ;;  %v493_v20 = vrot.slane %v461_v6, 4  ;;  %v494_v51 = vrot.slane %v462_v59, 4  ;;  %v495_v22 = vrot.slane %v463_v35, 4 }
  0xb3   :  { %v496_v50 = vrot.slane %v464_v34, 4  ;;  %v297_v44 = vmul.f32 %v265_v58, %v860_v62  ;;  %v408_v47 = vmul.f32 %v376_v28, %v973_v60  ;;  %v409_v56 = vmul.f32 %v377_v29, %v976_v61 }
  0xb4   :  { %v412_v32 = vmul.f32 %v380_v33, %v982_v0  ;;  %v497_v21 = vrot.slane %v465_v46, 4  ;;  %v436_v6 = vrot.slane %v1025_v52, 3  ;;  %v546_v34 = vrot.slane %v1080_v19, 3 }
  0xb5   :  { %v413_v59 = vmul.f32 %v381_v36, %v297_v44  ;;  %v524_v35 = vmul.f32 %v492_v25, %v408_v47  ;;  %v525_v57 = vmul.f32 %v493_v20, %v409_v56  ;;  %v526_v49 = vmul.f32 %v494_v51, %v410_v4 }
  0xb6   :  { %v527_v62 = vmul.f32 %v495_v22, %v411_v42  ;;  %v547_v58 = vrot.slane %v1080_v19, 4  ;;  %v528_v60 = vmul.f32 %v496_v50, %v412_v32  ;;  %v548_v61 = vrot.slane %v1080_v19, 5  ;;  %v1102_v42 = vpop.permute.xlu1 %428 }
  0xb7   :  { %v549_v63 = vrot.slane %v1080_v19, 6  ;;  %v550_v0 = vrot.slane %v1080_v19, 7  ;;  %v529_v28 = vmul.f32 %v497_v21, %v413_v59  ;;  %v551_v29 = vrot.slane %v1080_v19, 1 }
  0xb8   :  { %v576_v31 = vsel %vm19_vm2, %v546_v34, 1.0  ;;  %v577_v20 = vsel %vm19_vm2, %v547_v58, 1.0  ;;  %v578_v51 = vsel %vm19_vm2, %v548_v61, 1.0  ;;  %v581_v36 = vsel %vm19_vm2, %v1080_v19, 1.0 }
  0xb9   :  { %v579_v50 = vsel %vm19_vm2, %v549_v63, 1.0  ;;  %v580_v33 = vsel %vm19_vm2, %v550_v0, 1.0  ;;  %v1106_v21 = vsel %vm19_vm2, %v551_v29, 1.0  ;;  %v608_v32 = vrot.slane %v576_v31, 5 }
  0xba   :  { %v609_v4 = vrot.slane %v577_v20, 5  ;;  %v610_v8 = vrot.slane %v578_v51, 5  ;;  %v552_v46 = vrot.slane %v1080_v19, 2  ;;  %v611_v25 = vrot.slane %v579_v50, 5 }
  0xbb   :  { %v612_v22 = vrot.slane %v580_v33, 5  ;;  %v613_v44 = vrot.slane %v581_v36, 5  ;;  %v614_v47 = vrot.slane %v1106_v21, 5  ;;  %v437_v34 = vrot.slane %v1102_v42, 4 }
  0xbc   :  { %v1110_v56 = vmul.f32 %v609_v4, %v525_v57  ;;  %v1112_v59 = vmul.f32 %v610_v8, %v526_v49  ;;  %v1115_v58 = vmul.f32 %v608_v32, %v524_v35  ;;  %v1117_v61 = vmul.f32 %v611_v25, %v527_v62  ;;  %v1144_v25 = vpop.permute.xlu1 %544 }
  0xbd   :  { %v1119_v63 = vmul.f32 %v612_v22, %v528_v60  ;;  %v438_v0 = vrot.slane %v1102_v42, 5  ;;  %v1122_v29 = vmul.f32 %v613_v44, %v529_v28  ;;  %v439_v20 = vrot.slane %v1102_v42, 6 }
  0xbe   :  { %v672_v31 = vrot.slane %v1110_v56, 7  ;;  %v440_v57 = vrot.slane %v1102_v42, 7  ;;  %v441_v35 = vrot.slane %v1102_v42, 1  ;;  %v442_v62 = vrot.slane %v1102_v42, 2 }
  0xbf   :  { %v468_v60 = vsel %vm19_vm2, %v437_v34, 1.0  ;;  %v469_v28 = vsel %vm19_vm2, %v438_v0, 1.0  ;;  %v470_v50 = vsel %vm19_vm2, %v439_v20, 1.0  ;;  %v472_v36 = vsel %vm19_vm2, %v1102_v42, 1.0 }
  0xc0   :  { %v471_v33 = vsel %vm19_vm2, %v440_v57, 1.0  ;;  %v473_v32 = vsel %vm19_vm2, %v441_v35, 1.0  ;;  %v500_v4 = vrot.slane %v468_v60, 4  ;;  %v501_v8 = vrot.slane %v469_v28, 4 }
  0xc1   :  { %v443_v22 = vrot.slane %v1102_v42, 3  ;;  %v502_v44 = vrot.slane %v470_v50, 4  ;;  %v503_v34 = vrot.slane %v471_v33, 4  ;;  %v504_v0 = vrot.slane %v472_v36, 4 }
  0xc2   :  { %v505_v20 = vrot.slane %v473_v32, 4  ;;  %v305_v57 = vmul.f32 %v273_v14, %v922_v2  ;;  %v416_v51 = vmul.f32 %v384_v55, %v935_v15  ;;  %v1292_v35 = vrot.slane %v1023_v11, 3 }
  0xc3   :  { %v1293_v28 = vrot.slane %v1030_v12, 3  ;;  %v1294_v50 = vrot.slane %v1037_v53, 3  ;;  %v553_v36 = vrot.slane %v1144_v25, 3  ;;  %v554_v1 = vrot.slane %v1144_v25, 4 }
  0xc4   :  { %v417_v60 = vmul.f32 %v1292_v35, %v937_v16  ;;  %v1295_v2 = vrot.slane %v1041_v13, 3  ;;  %v532_v15 = vmul.f32 %v500_v4, %v416_v51  ;;  %v535_v11 = vmul.f32 %v503_v34, %v1057_v39 }
  0xc5   :  { %v418_v49 = vmul.f32 %v1293_v28, %v939_v17  ;;  %v420_v33 = vmul.f32 %v1294_v50, %v964_v43  ;;  %v555_v55 = vrot.slane %v1144_v25, 5  ;;  %v556_v17 = vrot.slane %v1144_v25, 6 }
  0xc6   :  { %v421_v14 = vmul.f32 %v1295_v2, %v305_v57  ;;  %v533_v5 = vmul.f32 %v501_v8, %v417_v60  ;;  %v557_v12 = vrot.slane %v1144_v25, 7  ;;  %v558_v32 = vrot.slane %v1144_v25, 1 }
  0xc7   :  { %v534_v16 = vmul.f32 %v502_v44, %v418_v49  ;;  %v536_v53 = vmul.f32 %v504_v0, %v420_v33  ;;  %v584_v35 = vsel %vm19_vm2, %v553_v36, 1.0  ;;  %v585_v13 = vsel %vm19_vm2, %v554_v1, 1.0 }
  0xc8   :  { %v537_v43 = vmul.f32 %v505_v20, %v421_v14  ;;  %v586_v39 = vsel %vm19_vm2, %v555_v55, 1.0  ;;  %v587_v49 = vsel %vm19_vm2, %v556_v17, 1.0  ;;  %v588_v51 = vsel %vm19_vm2, %v557_v12, 1.0 }
  0xc9   :  { %v589_v4 = vsel %vm19_vm2, %v1144_v25, 1.0  ;;  %v1186_v8 = vsel %vm19_vm2, %v558_v32, 1.0  ;;  %v616_v44 = vrot.slane %v584_v35, 5  ;;  %v617_v34 = vrot.slane %v585_v13, 5 }
  0xca   :  { %v618_v0 = vrot.slane %v586_v39, 5  ;;  %v619_v20 = vrot.slane %v587_v49, 5  ;;  %v620_v57 = vrot.slane %v588_v51, 5  ;;  %v621_v60 = vrot.slane %v589_v4, 5 }
  0xcb   :  { %v559_v28 = vrot.slane %v1144_v25, 2  ;;  %v622_v50 = vrot.slane %v1186_v8, 5  ;;  %v648_v33 = vmul.f32 %v616_v44, %v532_v15  ;;  %v649_v36 = vmul.f32 %v617_v34, %v533_v5 }
  0xcc   :  { %v1190_v1 = vmul.f32 %v618_v0, %v534_v16  ;;  %v1192_v2 = vmul.f32 %v619_v20, %v535_v11  ;;  %v1194_v14 = vmul.f32 %v620_v57, %v536_v53  ;;  %v1296_v55 = vrot.slane %v839_v40, 1 }
  0xcd   :  { %v1199_v12 = vmul.f32 %v621_v60, %v537_v43  ;;  %v693_v32 = vrot.slane %v649_v36, 7  ;;  %v1297_v25 = vrot.slane %v843_v41, 1  ;;  %v1298_v5 = vrot.slane %v892_v23, 1 }
  0xce   :  { %v182_v17 = vmul.f32 %v1296_v55, %v821_v26  ;;  %v695_v11 = vrot.slane %v1190_v1, 6  ;;  %v1299_v53 = vrot.slane %v896_v24, 1  ;;  %v267_v26 = vrot.slane %v968_v48, 2 }
  0xcf   :  { %v183_v15 = vmul.f32 %v1297_v25, %v847_v45  ;;  %v190_v16 = vmul.f32 %v1298_v5, %v876_v7  ;;  %v275_v43 = vrot.slane %v930_v9, 2  ;;  %v1300_v35 = vrot.slane %v960_v37, 2 }
  0xd0   :  { %v191_v40 = vmul.f32 %v1299_v53, %v900_v30  ;;  %v1301_v45 = vrot.slane %v926_v3, 2  ;;  %v1302_v7 = vrot.slane %v962_v38, 4  ;;  %v1303_v39 = vrot.slane %v999_v54, 4 }
  0xd1   :  { %v298_v41 = vmul.f32 %v1300_v35, %v182_v17  ;;  %v299_v30 = vmul.f32 %v267_v26, %v183_v15  ;;  %v382_v48 = vrot.slane %v1008_v27, 3  ;;  %v390_v3 = vrot.slane %v1045_v18, 3 }
  0xd2   :  { %v306_v13 = vmul.f32 %v1301_v45, %v190_v16  ;;  %v351_v23 = vsel %vm19_vm2, %v1302_v7, 1.0  ;;  %v359_v24 = vsel %vm19_vm2, %v1303_v39, 1.0  ;;  %v307_v9 = vmul.f32 %v275_v43, %v191_v40 }
  0xd3   :  { %v383_v37 = vrot.slane %v351_v23, 3  ;;  %v391_v49 = vrot.slane %v359_v24, 3  ;;  %v1304_v38 = vrot.slane %v1025_v52, 2  ;;  %v467_v54 = vsel %vm19_vm2, %v436_v6, 1.0 }
  0xd4   :  { %v414_v4 = vmul.f32 %v382_v48, %v298_v41  ;;  %v474_v27 = vsel %vm19_vm2, %v442_v62, 1.0  ;;  %v475_v18 = vsel %vm19_vm2, %v443_v22, 1.0  ;;  %v422_v44 = vmul.f32 %v390_v3, %v306_v13 }
  0xd5   :  { %v466_v51 = vsel %vm19_vm2, %v1304_v38, 1.0  ;;  %v415_v8 = vmul.f32 %v383_v37, %v299_v30  ;;  %v423_v34 = vmul.f32 %v391_v49, %v307_v9  ;;  %v499_v52 = vrot.slane %v467_v54, 4 }
  0xd6   :  { %v498_v0 = vrot.slane %v466_v51, 4  ;;  %v506_v20 = vrot.slane %v474_v27, 4  ;;  %v507_v57 = vrot.slane %v475_v18, 4  ;;  %v583_v6 = vsel %vm19_vm2, %v552_v46, 1.0 }
  0xd7   :  { %v591_v60 = vsel %vm19_vm2, %v559_v28, 1.0  ;;  %v531_v36 = vmul.f32 %v499_v52, %v415_v8  ;;  %v615_v42 = vrot.slane %v583_v6, 5  ;;  %v697_v22 = vrot.slane %v1192_v2, 5 }
  0xd8   :  { %v530_v62 = vmul.f32 %v498_v0, %v414_v4  ;;  %v623_v1 = vrot.slane %v591_v60, 5  ;;  %v538_v55 = vmul.f32 %v506_v20, %v422_v44  ;;  %v539_v17 = vmul.f32 %v507_v57, %v423_v34 }
  0xd9   :  { %v674_v25 = vsel %vm673_vm3, %v672_v31, %v1115_v58  ;;  %v647_v46 = vmul.f32 %v615_v42, %v531_v36  ;;  %v1305_v10 = vrot.slane %v1112_v59, 6  ;;  %v681_v15 = vrot.slane %v1119_v63, 4 }
  0xda   :  { %v646_v19 = vmul.f32 %v614_v47, %v530_v62  ;;  %v654_v5 = vmul.f32 %v622_v50, %v538_v55  ;;  %v1306_v2 = vrot.slane %v1117_v61, 5  ;;  %v684_v53 = vrot.slane %v1122_v29, 3 }
  0xdb   :  { %v677_v28 = vsel %vm676_vm4, %v1305_v10, %v674_v25  ;;  %v694_v56 = vsel %vm673_vm3, %v693_v32, %v648_v33  ;;  %v655_v58 = vmul.f32 %v623_v1, %v539_v17  ;;  %v690_v40 = vrot.slane %v647_v46, 1 }
  0xdc   :  { %v680_v16 = vsel %vm679_vm5, %v1306_v2, %v677_v28  ;;  %v687_v47 = vrot.slane %v646_v19, 2  ;;  %v696_v31 = vsel %vm676_vm4, %v695_v11, %v694_v56  ;;  %v699_v50 = vrot.slane %v1194_v14, 4 }
  0xdd   :  { %v683_v21 = vsel %vm682_vm6, %v681_v15, %v680_v16  ;;  %v698_v63 = vsel %vm679_vm5, %v697_v22, %v696_v31  ;;  %v701_v26 = vrot.slane %v1199_v12, 3  ;;  %v703_v32 = vrot.slane %v654_v5, 2 }
  0xde   :  { %v686_v59 = vsel %vm685_vm7, %v684_v53, %v683_v21  ;;  %v700_v33 = vsel %vm682_vm6, %v699_v50, %v698_v63  ;;  %v705_v43 = vrot.slane %v655_v58, 1 }
  0xdf   :  { %v689_v61 = vsel %vm688_vm8, %v687_v47, %v686_v59  ;;  %v702_v11 = vsel %vm685_vm7, %v701_v26, %v700_v33 }
  0xe0   :  { %v692_v29 = vsel %vm691_vm9, %v690_v40, %v689_v61  ;;  %v704_v35 = vsel %vm688_vm8, %v703_v32, %v702_v11 }
  0xe1   :  { %709 = vst [vmem:[#allocation2] sm:$0xff] %v692_v29  ;;  %v706_v14 = vsel %vm691_vm9, %v705_v43, %v704_v35 }
  0xe2   :  { %710 = vst [vmem:[#allocation2 + $0x8] sm:$0xff] %v706_v14 }
  0xe3   :  { %756 = shalt.err (!%p753_p4)
}
  0xe4   :  { %s757_s18 = scalar_lea.hbm %s1291_s2, 256 }
  0xe5   :  { %p758_p5 = scmp.ne.s32.totalorder %s1291_s2, %s757_s18  ;;  %p761_p6 = scmp.lt.u32.totalorder %s757_s18, %s1291_s2 }
  0xe7   :  { %p763_p7 = pnand %p761_p6, %p758_p5 }
  0xe9   :  { %766 = shalt.err (!%p763_p7)
}
  0xea   :  { %s776_s23 = smov 128   ;;  %s777_s24 = smov 8  }
  0xeb   :  { %722 = dma.vmem_to_hbm [thread:$0]  %s717_s14, 256, %s1291_s2, [#allocation3], %s776_s23, %s776_s23, %s777_s24  }
  0xec   :  { %767 = dma.done.wait [#allocation3], 256  }
  0xed   :  { %768 = vsyncadd [#allocation3], 4294967040 }
  0xee   :  { %726 = vsyncpa [#allocation3], 1 }

</bundles_post_ra>
